<compile_context>
chip_gen: v5e
topology: v5e:2x2
jax: 0.10.0
libtpu: 0.0.40
codegen_flags: <defaults>
</compile_context>

<pallas_src>
import jax
import jax.numpy as jnp
from jax.experimental import pallas as pl
from jax.experimental.pallas import tpu as pltpu


def _round_up(x, m):
    return ((x + m - 1) // m) * m


# ----------------------------- Pallas kernel --------------------------------
def critic_kernel(
    state_ref, action_ref,          # (TILE_B, state_dim) bf16, (TILE_B, act_dim) bf16
    w1_ref, w2_ref, w3_ref,         # bf16: [state_dim,h1], [h1,h2], [h2,64]
    wa_ref, wm_ref, wq_ref,         # bf16: [act_dim,64], [128,mh], [mh,qpad]
    bias_ref,                       # f32:  [8, BW] packed biases
    out_ref,                        # f32:  (TILE_B, qpad)
):
    f32 = jnp.float32
    bf16 = jnp.bfloat16
    h1 = w1_ref.shape[1]
    h2 = w2_ref.shape[1]
    mh = wm_ref.shape[1]
    qp = wq_ref.shape[1]

    # packed biases, static slices (rows: b1, b2, b3, ba, bm, bq)
    b1 = bias_ref[0:1, :h1]
    b2 = bias_ref[1:2, :h2]
    b3 = bias_ref[2:3, :64]
    ba = bias_ref[3:4, :64]
    bm = bias_ref[4:5, :mh]
    bq = bias_ref[5:6, :qp]

    # state branch: bf16 MXU matmuls, f32 accumulation + f32 elementwise
    x = jnp.dot(state_ref[...], w1_ref[...], preferred_element_type=f32) + b1
    x = jnp.maximum(x, 0.0)
    x = jnp.dot(x.astype(bf16), w2_ref[...], preferred_element_type=f32) + b2
    x = jnp.maximum(x, 0.0)
    # Dropout(p=0.5) in eval mode: identity.
    # TODO(synk): training-mode dropout via pltpu.prng_random_bits.
    x = jnp.dot(x.astype(bf16), w3_ref[...], preferred_element_type=f32) + b3
    x = jnp.maximum(x, 0.0)

    # action branch
    a = jnp.dot(action_ref[...], wa_ref[...], preferred_element_type=f32) + ba
    a = jnp.maximum(a, 0.0)

    # merged layer: cat([x, a]) @ Wm  ==  x @ Wm[0:64] + a @ Wm[64:128]
    # (static, tile-aligned sublane slices of the resident packed weight;
    #  avoids the masked half-lane concat staging of the previous version)
    m = (jnp.dot(x.astype(bf16), wm_ref[0:64, :], preferred_element_type=f32)
         + jnp.dot(a.astype(bf16), wm_ref[64:128, :], preferred_element_type=f32)
         + bm)
    m = jnp.maximum(m, 0.0)

    # Q layer (lane-padded output, no activation)
    q = jnp.dot(m.astype(bf16), wq_ref[...], preferred_element_type=f32) + bq
    out_ref[...] = q.astype(out_ref.dtype)


# ------------------------------ wrapper --------------------------------------
def _pick_tile_b(B):
    for t in (1024, 512, 256, 128):
        if B >= t:
            return t
    return 128


def critic_forward(state, action, params):
    """state: [B, state_dim] f32, action: [B, action_dim] f32 -> [B, qvalue] f32."""
    f32, bf16 = jnp.float32, jnp.bfloat16
    B, state_dim = state.shape
    action_dim = action.shape[1]
    h1 = params["w1"].shape[1]
    h2 = params["w2"].shape[1]
    mh = params["wm"].shape[1]
    qvalue = params["wq"].shape[1]
    qpad = _round_up(qvalue, 128)

    tile_b = _pick_tile_b(B)
    Bp = _round_up(B, tile_b)

    # pad batch to a multiple of the tile; cast matmul operands to bf16
    state_p = jnp.zeros((Bp, state_dim), bf16).at[:B].set(state.astype(bf16))
    action_p = jnp.zeros((Bp, action_dim), bf16).at[:B].set(action.astype(bf16))

    w1 = params["w1"].astype(bf16)
    w2 = params["w2"].astype(bf16)
    w3 = params["w3"].astype(bf16)
    wa = params["wa"].astype(bf16)
    wm = params["wm"].astype(bf16)
    wq = jnp.zeros((mh, qpad), bf16).at[:, :qvalue].set(params["wq"].astype(bf16))

    # pack all six biases into one (8, BW) f32 operand (one DMA)
    bw = _round_up(max(h1, h2, 64, mh, qvalue), 128)
    bias = jnp.zeros((8, bw), f32)
    bias = bias.at[0, :h1].set(params["b1"].reshape(-1))
    bias = bias.at[1, :h2].set(params["b2"].reshape(-1))
    bias = bias.at[2, :64].set(params["b3"].reshape(-1))
    bias = bias.at[3, :64].set(params["ba"].reshape(-1))
    bias = bias.at[4, :mh].set(params["bm"].reshape(-1))
    bias = bias.at[5, :qvalue].set(params["bq"].reshape(-1))

    def batch_spec(feat):
        return pl.BlockSpec((tile_b, feat), lambda i: (i, 0))

    def resident(arr):
        return pl.BlockSpec(arr.shape, lambda i: (0, 0))

    out = pl.pallas_call(
        critic_kernel,
        out_shape=jax.ShapeDtypeStruct((Bp, qpad), f32),
        grid=(Bp // tile_b,),
        in_specs=[
            batch_spec(state_dim),
            batch_spec(action_dim),
            resident(w1), resident(w2), resident(w3),
            resident(wa), resident(wm), resident(wq),
            resident(bias),
        ],
        out_specs=batch_spec(qpad),
        compiler_params=pltpu.CompilerParams(
            dimension_semantics=("parallel",)),
    )(state_p, action_p, w1, w2, w3, wa, wm, wq, bias)

    return out[:B, :qvalue]


# --------------------------- parameter init ----------------------------------
def init_linear(key, in_f, out_f):
    """Deterministic PyTorch-style Linear init; weight returned as [in, out]."""
    kw, kb = jax.random.split(key)
    bound = 1.0 / jnp.sqrt(jnp.float32(in_f))
    w = jax.random.uniform(kw, (in_f, out_f), jnp.float32, -bound, bound)
    b = jax.random.uniform(kb, (1, out_f), jnp.float32, -bound, bound)
    return w, b


def init_critic_params(key, state_dim, h1, h2, merged_hidden, action_dim, qvalue):
    ks = jax.random.split(key, 6)
    w1, b1 = init_linear(ks[0], state_dim, h1)
    w2, b2 = init_linear(ks[1], h1, h2)
    w3, b3 = init_linear(ks[2], h2, 64)
    wa, ba = init_linear(ks[3], action_dim, 64)
    wm, bm = init_linear(ks[4], 128, merged_hidden)
    wq, bq = init_linear(ks[5], merged_hidden, qvalue)
    return dict(w1=w1, b1=b1, w2=w2, b2=b2, w3=w3, b3=b3,
                wa=wa, ba=ba, wm=wm, bm=bm, wq=wq, bq=bq)


# --------------------------- reference (plain JAX) ----------------------------
def critic_ref(state, action, p):
    """Mirrors the kernel's bf16-operand / f32-accumulate math."""
    bf16, f32 = jnp.bfloat16, jnp.float32

    def mm(x, w):
        return jnp.dot(x.astype(bf16), w.astype(bf16), preferred_element_type=f32)

    x = jax.nn.relu(mm(state, p["w1"]) + p["b1"])
    x = jax.nn.relu(mm(x, p["w2"]) + p["b2"])
    x = jax.nn.relu(mm(x, p["w3"]) + p["b3"])
    a = jax.nn.relu(mm(action, p["wa"]) + p["ba"])
    cat = jnp.concatenate([x, a], axis=1)
    m = jax.nn.relu(mm(cat, p["wm"]) + p["bm"])
    return mm(m, p["wq"]) + p["bq"]


if __name__ == "__main__":
    # Small, consistent shapes:
    B = 8
    state_dim = 32
    state_hidden1 = 64
    state_hidden2 = 64
    merged_hidden = 128
    action_dim = 16
    qvalue = 1

    key = jax.random.PRNGKey(0)
    k_state, k_action, k_params = jax.random.split(key, 3)

    state = jax.random.normal(k_state, (B, state_dim), jnp.float32)
    action = jax.random.normal(k_action, (B, action_dim), jnp.float32)
    params = init_critic_params(
        k_params, state_dim, state_hidden1, state_hidden2,
        merged_hidden, action_dim, qvalue)

    q = critic_forward(state, action, params)
    q = jax.block_until_ready(q)

    q_ref = critic_ref(state, action, params)
    assert q.shape == (B, qvalue)
    assert jnp.allclose(q, q_ref, atol=1e-2, rtol=1e-2), "mismatch vs reference"

    print("KERNEL_OK")
</pallas_src>

<mosaic_0001>
module attributes {stable_mosaic.version = 11 : i64} {
  func.func @critic_kernel(%arg0: i32, %arg1: memref<128x32xbf16, #tpu.memory_space<vmem>>, %arg2: memref<128x16xbf16, #tpu.memory_space<vmem>>, %arg3: memref<32x64xbf16, #tpu.memory_space<vmem>>, %arg4: memref<64x64xbf16, #tpu.memory_space<vmem>>, %arg5: memref<64x64xbf16, #tpu.memory_space<vmem>>, %arg6: memref<16x64xbf16, #tpu.memory_space<vmem>>, %arg7: memref<128x128xbf16, #tpu.memory_space<vmem>>, %arg8: memref<128x128xbf16, #tpu.memory_space<vmem>>, %arg9: memref<8x128xf32, #tpu.memory_space<vmem>>, %arg10: memref<128x128xf32, #tpu.memory_space<vmem>>) attributes {dimension_semantics = [#tpu.dimension_semantics<parallel>], iteration_bounds = array<i64: 1>, scalar_prefetch = 0 : i64, scratch_operands = 0 : i64, tpu.core_type = #tpu.core_type<tc>, window_params = [{transform_indices = @transform_0, window_bounds = array<i64: 128, 32>}, {transform_indices = @transform_1, window_bounds = array<i64: 128, 16>}, {pipeline_mode = #tpu.pipeline_mode<synchronous>, transform_indices = @transform_2, window_bounds = array<i64: 32, 64>}, {pipeline_mode = #tpu.pipeline_mode<synchronous>, transform_indices = @transform_3, window_bounds = array<i64: 64, 64>}, {pipeline_mode = #tpu.pipeline_mode<synchronous>, transform_indices = @transform_4, window_bounds = array<i64: 64, 64>}, {pipeline_mode = #tpu.pipeline_mode<synchronous>, transform_indices = @transform_5, window_bounds = array<i64: 16, 64>}, {pipeline_mode = #tpu.pipeline_mode<synchronous>, transform_indices = @transform_6, window_bounds = array<i64: 128, 128>}, {pipeline_mode = #tpu.pipeline_mode<synchronous>, transform_indices = @transform_7, window_bounds = array<i64: 128, 128>}, {pipeline_mode = #tpu.pipeline_mode<synchronous>, transform_indices = @transform_8, window_bounds = array<i64: 8, 128>}, {transform_indices = @transform_9, window_bounds = array<i64: 128, 128>}]} {
    %c0 = arith.constant 0 : index
    %c0_0 = arith.constant 0 : index
    %0 = vector.load %arg9[%c0, %c0_0] : memref<8x128xf32, #tpu.memory_space<vmem>>, vector<1x64xf32>
    %c1 = arith.constant 1 : index
    %c0_1 = arith.constant 0 : index
    %1 = vector.load %arg9[%c1, %c0_1] : memref<8x128xf32, #tpu.memory_space<vmem>>, vector<1x64xf32>
    %c2 = arith.constant 2 : index
    %c0_2 = arith.constant 0 : index
    %2 = vector.load %arg9[%c2, %c0_2] : memref<8x128xf32, #tpu.memory_space<vmem>>, vector<1x64xf32>
    %c3 = arith.constant 3 : index
    %c0_3 = arith.constant 0 : index
    %3 = vector.load %arg9[%c3, %c0_3] : memref<8x128xf32, #tpu.memory_space<vmem>>, vector<1x64xf32>
    %c4 = arith.constant 4 : index
    %c0_4 = arith.constant 0 : index
    %4 = vector.load %arg9[%c4, %c0_4] : memref<8x128xf32, #tpu.memory_space<vmem>>, vector<1x128xf32>
    %c5 = arith.constant 5 : index
    %c0_5 = arith.constant 0 : index
    %5 = vector.load %arg9[%c5, %c0_5] : memref<8x128xf32, #tpu.memory_space<vmem>>, vector<1x128xf32>
    %c0_6 = arith.constant 0 : index
    %c0_7 = arith.constant 0 : index
    %6 = vector.load %arg1[%c0_6, %c0_7] : memref<128x32xbf16, #tpu.memory_space<vmem>>, vector<128x32xbf16>
    %c0_8 = arith.constant 0 : index
    %c0_9 = arith.constant 0 : index
    %7 = vector.load %arg3[%c0_8, %c0_9] : memref<32x64xbf16, #tpu.memory_space<vmem>>, vector<32x64xbf16>
    %cst = arith.constant dense<0.000000e+00> : vector<128x64xf32>
    %8 = tpu.matmul %6, %7, %cst {dimension_numbers = #tpu.dot_dimension_numbers<[1], [0], [0], [1], [0, 0, 1, 1], [], []>} : vector<128x32xbf16>, vector<32x64xbf16>, vector<128x64xf32> -> vector<128x64xf32>
    %9 = vector.broadcast %0 : vector<1x64xf32> to vector<128x64xf32>
    %10 = arith.addf %8, %9 : vector<128x64xf32>
    %cst_10 = arith.constant 0.000000e+00 : f32
    %11 = vector.broadcast %cst_10 : f32 to vector<128x64xf32>
    %12 = arith.maximumf %10, %11 : vector<128x64xf32>
    %13 = arith.truncf %12 : vector<128x64xf32> to vector<128x64xbf16>
    %c0_11 = arith.constant 0 : index
    %c0_12 = arith.constant 0 : index
    %14 = vector.load %arg4[%c0_11, %c0_12] : memref<64x64xbf16, #tpu.memory_space<vmem>>, vector<64x64xbf16>
    %cst_13 = arith.constant dense<0.000000e+00> : vector<128x64xf32>
    %15 = tpu.matmul %13, %14, %cst_13 {dimension_numbers = #tpu.dot_dimension_numbers<[1], [0], [0], [1], [0, 0, 1, 1], [], []>} : vector<128x64xbf16>, vector<64x64xbf16>, vector<128x64xf32> -> vector<128x64xf32>
    %16 = vector.broadcast %1 : vector<1x64xf32> to vector<128x64xf32>
    %17 = arith.addf %15, %16 : vector<128x64xf32>
    %cst_14 = arith.constant 0.000000e+00 : f32
    %18 = vector.broadcast %cst_14 : f32 to vector<128x64xf32>
    %19 = arith.maximumf %17, %18 : vector<128x64xf32>
    %20 = arith.truncf %19 : vector<128x64xf32> to vector<128x64xbf16>
    %c0_15 = arith.constant 0 : index
    %c0_16 = arith.constant 0 : index
    %21 = vector.load %arg5[%c0_15, %c0_16] : memref<64x64xbf16, #tpu.memory_space<vmem>>, vector<64x64xbf16>
    %cst_17 = arith.constant dense<0.000000e+00> : vector<128x64xf32>
    %22 = tpu.matmul %20, %21, %cst_17 {dimension_numbers = #tpu.dot_dimension_numbers<[1], [0], [0], [1], [0, 0, 1, 1], [], []>} : vector<128x64xbf16>, vector<64x64xbf16>, vector<128x64xf32> -> vector<128x64xf32>
    %23 = vector.broadcast %2 : vector<1x64xf32> to vector<128x64xf32>
    %24 = arith.addf %22, %23 : vector<128x64xf32>
    %cst_18 = arith.constant 0.000000e+00 : f32
    %25 = vector.broadcast %cst_18 : f32 to vector<128x64xf32>
    %26 = arith.maximumf %24, %25 : vector<128x64xf32>
    %c0_19 = arith.constant 0 : index
    %c0_20 = arith.constant 0 : index
    %27 = vector.load %arg2[%c0_19, %c0_20] : memref<128x16xbf16, #tpu.memory_space<vmem>>, vector<128x16xbf16>
    %c0_21 = arith.constant 0 : index
    %c0_22 = arith.constant 0 : index
    %28 = vector.load %arg6[%c0_21, %c0_22] : memref<16x64xbf16, #tpu.memory_space<vmem>>, vector<16x64xbf16>
    %cst_23 = arith.constant dense<0.000000e+00> : vector<128x64xf32>
    %29 = tpu.matmul %27, %28, %cst_23 {dimension_numbers = #tpu.dot_dimension_numbers<[1], [0], [0], [1], [0, 0, 1, 1], [], []>} : vector<128x16xbf16>, vector<16x64xbf16>, vector<128x64xf32> -> vector<128x64xf32>
    %30 = vector.broadcast %3 : vector<1x64xf32> to vector<128x64xf32>
    %31 = arith.addf %29, %30 : vector<128x64xf32>
    %cst_24 = arith.constant 0.000000e+00 : f32
    %32 = vector.broadcast %cst_24 : f32 to vector<128x64xf32>
    %33 = arith.maximumf %31, %32 : vector<128x64xf32>
    %34 = arith.truncf %26 : vector<128x64xf32> to vector<128x64xbf16>
    %c0_25 = arith.constant 0 : index
    %c0_26 = arith.constant 0 : index
    %35 = vector.load %arg7[%c0_25, %c0_26] : memref<128x128xbf16, #tpu.memory_space<vmem>>, vector<64x128xbf16>
    %cst_27 = arith.constant dense<0.000000e+00> : vector<128x128xf32>
    %36 = tpu.matmul %34, %35, %cst_27 {dimension_numbers = #tpu.dot_dimension_numbers<[1], [0], [0], [1], [0, 0, 1, 1], [], []>} : vector<128x64xbf16>, vector<64x128xbf16>, vector<128x128xf32> -> vector<128x128xf32>
    %37 = arith.truncf %33 : vector<128x64xf32> to vector<128x64xbf16>
    %c64 = arith.constant 64 : index
    %c0_28 = arith.constant 0 : index
    %38 = vector.load %arg7[%c64, %c0_28] : memref<128x128xbf16, #tpu.memory_space<vmem>>, vector<64x128xbf16>
    %cst_29 = arith.constant dense<0.000000e+00> : vector<128x128xf32>
    %39 = tpu.matmul %37, %38, %cst_29 {dimension_numbers = #tpu.dot_dimension_numbers<[1], [0], [0], [1], [0, 0, 1, 1], [], []>} : vector<128x64xbf16>, vector<64x128xbf16>, vector<128x128xf32> -> vector<128x128xf32>
    %40 = arith.addf %36, %39 : vector<128x128xf32>
    %41 = vector.broadcast %4 : vector<1x128xf32> to vector<128x128xf32>
    %42 = arith.addf %40, %41 : vector<128x128xf32>
    %cst_30 = arith.constant 0.000000e+00 : f32
    %43 = vector.broadcast %cst_30 : f32 to vector<128x128xf32>
    %44 = arith.maximumf %42, %43 : vector<128x128xf32>
    %45 = arith.truncf %44 : vector<128x128xf32> to vector<128x128xbf16>
    %c0_31 = arith.constant 0 : index
    %c0_32 = arith.constant 0 : index
    %46 = vector.load %arg8[%c0_31, %c0_32] : memref<128x128xbf16, #tpu.memory_space<vmem>>, vector<128x128xbf16>
    %cst_33 = arith.constant dense<0.000000e+00> : vector<128x128xf32>
    %47 = tpu.matmul %45, %46, %cst_33 {dimension_numbers = #tpu.dot_dimension_numbers<[1], [0], [0], [1], [0, 0, 1, 1], [], []>} : vector<128x128xbf16>, vector<128x128xbf16>, vector<128x128xf32> -> vector<128x128xf32>
    %48 = vector.broadcast %5 : vector<1x128xf32> to vector<128x128xf32>
    %49 = arith.addf %47, %48 : vector<128x128xf32>
    %c0_34 = arith.constant 0 : index
    %c0_35 = arith.constant 0 : index
    %50 = vector.load %arg10[%c0_34, %c0_35] : memref<128x128xf32, #tpu.memory_space<vmem>>, vector<128x128xf32>
    tpu.vector_store %arg10[%c0_34, %c0_35], %49 {strides = array<i32>} : memref<128x128xf32, #tpu.memory_space<vmem>>, vector<128x128xf32>,
    return
  }
  func.func @transform_0(%arg0: i32) -> (i32, i32) {
    %c0_i32 = arith.constant 0 : i32
    %c0_i32_0 = arith.constant 0 : i32
    return %arg0, %c0_i32 : i32, i32
  }
  func.func @transform_1(%arg0: i32) -> (i32, i32) {
    %c0_i32 = arith.constant 0 : i32
    %c0_i32_0 = arith.constant 0 : i32
    return %arg0, %c0_i32 : i32, i32
  }
  func.func @transform_2(%arg0: i32) -> (i32, i32) {
    %c0_i32 = arith.constant 0 : i32
    %c0_i32_0 = arith.constant 0 : i32
    %c0_i32_1 = arith.constant 0 : i32
    return %c0_i32, %c0_i32_0 : i32, i32
  }
  func.func @transform_3(%arg0: i32) -> (i32, i32) {
    %c0_i32 = arith.constant 0 : i32
    %c0_i32_0 = arith.constant 0 : i32
    %c0_i32_1 = arith.constant 0 : i32
    return %c0_i32, %c0_i32_0 : i32, i32
  }
  func.func @transform_4(%arg0: i32) -> (i32, i32) {
    %c0_i32 = arith.constant 0 : i32
    %c0_i32_0 = arith.constant 0 : i32
    %c0_i32_1 = arith.constant 0 : i32
    return %c0_i32, %c0_i32_0 : i32, i32
  }
  func.func @transform_5(%arg0: i32) -> (i32, i32) {
    %c0_i32 = arith.constant 0 : i32
    %c0_i32_0 = arith.constant 0 : i32
    %c0_i32_1 = arith.constant 0 : i32
    return %c0_i32, %c0_i32_0 : i32, i32
  }
  func.func @transform_6(%arg0: i32) -> (i32, i32) {
    %c0_i32 = arith.constant 0 : i32
    %c0_i32_0 = arith.constant 0 : i32
    %c0_i32_1 = arith.constant 0 : i32
    return %c0_i32, %c0_i32_0 : i32, i32
  }
  func.func @transform_7(%arg0: i32) -> (i32, i32) {
    %c0_i32 = arith.constant 0 : i32
    %c0_i32_0 = arith.constant 0 : i32
    %c0_i32_1 = arith.constant 0 : i32
    return %c0_i32, %c0_i32_0 : i32, i32
  }
  func.func @transform_8(%arg0: i32) -> (i32, i32) {
    %c0_i32 = arith.constant 0 : i32
    %c0_i32_0 = arith.constant 0 : i32
    %c0_i32_1 = arith.constant 0 : i32
    return %c0_i32, %c0_i32_0 : i32, i32
  }
  func.func @transform_9(%arg0: i32) -> (i32, i32) {
    %c0_i32 = arith.constant 0 : i32
    %c0_i32_0 = arith.constant 0 : i32
    return %arg0, %c0_i32 : i32, i32
  }
}

</mosaic_0001>

<bundles_post_ra>
// kernel: tpu_custom_call.1
= control target key start
LH: loop header
LB: loop body
LE: loop exit
PB: predicated region body
PF: predicated region fallthrough
CT: control target
= control target key end

     0   :  { %14 = vsyncpa [#allocation3], 0  ;;  %s1824_s0 = inlined_call_operand.vmem [shape: bf16[128,32], index: 0, kind: input, shape index: {}]   ;;  %s1825_s1 = inlined_call_operand.vmem [shape: bf16[128,16], index: 1, kind: input, shape index: {}]   ;;  %s1826_s2 = inlined_call_operand.vmem [shape: bf16[32,64], index: 2, kind: input, shape index: {}]   ;;  %s1827_s3 = inlined_call_operand.hbm [shape: bf16[64,64], index: 3, kind: input, shape index: {}]   ;;  %s1828_s4 = inlined_call_operand.hbm [shape: bf16[64,64], index: 4, kind: input, shape index: {}]   ;;  %s1829_s5 = inlined_call_operand.hbm [shape: bf16[16,64], index: 5, kind: input, shape index: {}]   ;;  %s1830_s6 = inlined_call_operand.vmem [shape: bf16[128,128], index: 6, kind: input, shape index: {}]   ;;  %s1831_s7 = inlined_call_operand.vmem [shape: bf16[128,128], index: 7, kind: input, shape index: {}]   ;;  %s1832_s8 = inlined_call_operand.hbm [shape: f32[8,128], index: 8, kind: input, shape index: {}]   ;;  %s1833_s9 = inlined_call_operand.hbm [shape: f32[128,128], index: 9, kind: output, shape index: {}]  }
   0x1   :  { %15 = vsyncpa [#allocation6], 0 }
   0x2   :  { %16 = vsyncpa [#allocation9], 0 }
   0x3   :  { %17 = vsyncpa [#allocation4], 0  ;;  %s41_s11 = sshll.u32 %s1828_s4, 4  ;;  %s1510_s12 = smov [#allocation5]   ;;  %s42_s11 = int_to_ptr.hbm [resolvable:$true] %s41_s11 }
   0x4   :  { %s43_s13 = sshll.u32 %s1510_s12, 4  ;;  %s28_s16 = sshll.u32 %s1827_s3, 4  ;;  %s44_s13 = int_to_ptr.vmem [resolvable:$true] %s43_s13  ;;  %s29_s16 = int_to_ptr.hbm [resolvable:$true] %s28_s16 }
   0x5   :  { %s1511_s17 = smov 64   ;;  %s1512_s18 = smov 4  }
   0x6   :  { %49 = dma.hbm_to_vmem [thread:$0]  %s42_s11, 512, %s44_s13, [#allocation6], %s1511_s17, %s1511_s17, %s1512_s18  }
   0x7   :  { %s1513_s19 = smov [#allocation2]   ;;  %s54_s23 = sshll.u32 %s1829_s5, 4  ;;  %s55_s23 = int_to_ptr.hbm [resolvable:$true] %s54_s23 }
   0x8   :  { %s30_s20 = sshll.u32 %s1513_s19, 4  ;;  %s72_s25 = sshll.u32 %s1832_s8, 4  ;;  %s31_s20 = int_to_ptr.vmem [resolvable:$true] %s30_s20  ;;  %s73_s25 = int_to_ptr.hbm [resolvable:$true] %s72_s25 }
   0x9   :  { %36 = dma.hbm_to_vmem [thread:$0]  %s29_s16, 512, %s31_s20, [#allocation3], %s1511_s17, %s1511_s17, %s1512_s18  }
   0xa   :  { %s1514_s26 = smov [#allocation7]   ;;  %s1515_s3 = smov [#allocation8]  }
   0xb   :  { %s56_s27 = sshll.u32 %s1514_s26, 4  ;;  %s74_s28 = sshll.u32 %s1515_s3, 4  ;;  %s57_s27 = int_to_ptr.vmem [resolvable:$true] %s56_s27  ;;  %s75_s28 = int_to_ptr.vmem [resolvable:$true] %s74_s28 }
   0xc   :  { %62 = dma.hbm_to_vmem [thread:$0]  %s55_s23, 128, %s57_s27, [#allocation6], %s1511_s17, %s1511_s17, %s1512_s18  }
   0xd   :  { %77 = dma.hbm_to_vmem [thread:$0]  %s73_s25, 128, %s75_s28, [#allocation9]  }
   0xe   :  { %1502 = dma.done.wait [#allocation3], 512  }
   0xf   :  { %1503 = vsyncadd [#allocation3], 4294966784 }
  0x10   :  { %1504 = dma.done.wait [#allocation6], 640  }
  0x11   :  { %1505 = vsyncadd [#allocation6], 4294966656 }
  0x12   :  { %1506 = dma.done.wait [#allocation9], 128  }
  0x13   :  { %1507 = vsyncadd [#allocation9], 4294967168  ;;  %v1327_v0 = vld [vmem:[%s1826_s2 + $0x8] sm:$0xff]  ;;  %v1326_v1 = vld [vmem:[%s1826_s2] sm:$0xff]  ;;  %vm174_vm0 = vcmask 261120   ;;  %vm305_vm1 = vcmask 523264  }
  0x14   :  { %205 = vmatpush.bf16.msra.mxu0 %v1327_v0  ;;  %1361 = vmatpush.bf16.msra.mxu1 %v1327_v0  ;;  %v1318_v2 = vld [vmem:[%s1824_s0] sm:$0xff]  ;;  %v1319_v3 = vld [vmem:[%s1824_s0 + $0x8] sm:$0xff]  ;;  %v1320_v4 = vld [vmem:[%s1824_s0 + $0x10] sm:$0xff]  ;;  %vm590_vm2 = vcmask 130048   ;;  %s1083_s20 = sshll.u32 %s1833_s9, 4  ;;  %s1517_s21 = smov 128   ;;  %s1084_s20 = int_to_ptr.hbm [resolvable:$true] %s1083_s20 }
  0x15   :  { %v1321_v5 = vld [vmem:[%s1824_s0 + $0x18] sm:$0xff]  ;;  %v1322_v6 = vld [vmem:[%s1824_s0 + $0x20] sm:$0xff]  ;;  %v1323_v8 = vld [vmem:[%s1824_s0 + $0x28] sm:$0xff]  ;;  %s1518_s22 = smov 8  }
  0x16   :  { %v1325_v7 = vld [vmem:[%s1824_s0 + $0x38] sm:$0xff]  ;;  %v1324_v10 = vld [vmem:[%s1824_s0 + $0x30] sm:$0xff]  ;;  %v1329_v12 = vld [vmem:[#allocation2 + $0x8] sm:$0xff] }
  0x17   :  { %v1331_v9 = vld [vmem:[#allocation2 + $0x18] sm:$0xff]  ;;  %v1330_v11 = vld [vmem:[#allocation2 + $0x10] sm:$0xff]  ;;  %v1328_v13 = vld [vmem:[#allocation2] sm:$0xff] }
  0x18   :  { %206 = vmatpush.bf16.msra.mxu0 %v1326_v1  ;;  %1362 = vmatpush.bf16.msra.mxu1 %v1326_v1  ;;  %v1619_v15 = vld [vmem:[#allocation8] ss:$0 sm:$0xff]  ;;  %v1335_v30 = vld [vmem:[#allocation5 + $0x18] sm:$0xff]  ;;  %v1334_v44 = vld [vmem:[#allocation5 + $0x10] sm:$0xff] }
  0x19   :  { %1363 = vmatpush.bf16.msra.mxu2 %v1331_v9  ;;  %v1333_v52 = vld [vmem:[#allocation5 + $0x8] sm:$0xff]  ;;  %v1344_v60 = vld [vmem:[#allocation7] sm:$0xff] }
  0x1a   :  { %v1332_v61 = vld [vmem:[#allocation5] sm:$0xff]  ;;  %622 = vmatpush.bf16.msra.mxu3 %v1344_v60 }
  0x1b   :  { %1138 = vmatmul.msk.bf16.vlgmr.msra.gmra.mxu0 %vm174_vm0, %v1318_v2  ;;  %1145 = vmatmul.msk.bf16.vlgmr.msra.gmra.mxu1 %vm174_vm0, %v1325_v7  ;;  %v1336_v63 = vld [vmem:[%s1825_s1] sm:$0xff] }
  0x1c   :  { %334 = vmatpush.bf16.msrb.mxu1 %v1331_v9 }
  0x1d   :  { %1364 = vmatpush.bf16.msra.mxu2 %v1330_v11  ;;  %1230 = vmatmul.msk.bf16.vlgmr.msra.gmra.mxu3 %vm590_vm2, %v1336_v63 }
  0x20   :  { %335 = vmatpush.bf16.msrb.mxu1 %v1330_v11 }
  0x21   :  { %1365 = vmatpush.bf16.msra.mxu2 %v1329_v12 }
  0x24   :  { %336 = vmatpush.bf16.msrb.mxu1 %v1329_v12  ;;  %v1337_v12 = vld [vmem:[%s1825_s1 + $0x8] sm:$0xff] }
  0x25   :  { %1366 = vmatpush.bf16.msra.mxu2 %v1328_v13 }
  0x28   :  { %337 = vmatpush.bf16.msrb.mxu1 %v1328_v13 }
  0x29   :  { %464 = vmatpush.bf16.msrb.mxu2 %v1335_v30 }
  0x2b   :  { %1139 = vmatmul.msk.bf16.gmra.mxu0 %vm174_vm0, %v1319_v3 }
  0x2d   :  { %465 = vmatpush.bf16.msrb.mxu2 %v1334_v44  ;;  %1231 = vmatmul.msk.bf16.gmra.mxu3 %vm590_vm2, %v1337_v12 }
  0x31   :  { %466 = vmatpush.bf16.msrb.mxu2 %v1333_v52  ;;  %v1350_v52 = vld [vmem:[%s1830_s6 + $0x28] sm:$0xff] }
  0x35   :  { %467 = vmatpush.bf16.msrb.mxu2 %v1332_v61  ;;  %v1346_v61 = vld [vmem:[%s1830_s6 + $0x8] sm:$0xff] }
  0x3b   :  { %1140 = vmatmul.msk.bf16.gmra.mxu0 %vm174_vm0, %v1320_v4 }
  0x4b   :  { %1141 = vmatmul.msk.bf16.gmra.mxu0 %vm174_vm0, %v1321_v5 }
  0x5b   :  { %1142 = vmatmul.msk.bf16.gmra.mxu0 %vm174_vm0, %v1322_v6 }
  0x6b   :  { %1143 = vmatmul.msk.bf16.gmra.mxu0 %vm174_vm0, %v1323_v8 }
  0x7b   :  { %1144 = vmatmul.msk.bf16.gmra.mxu0 %vm174_vm0, %v1324_v10 }
  0x98   :  { %v208_v14 = vpop.f32.mrf.mxu0  ;;  %v243_v2 = vpop.f32.mrf.mxu1 }
  0x99   :  { %v209_v16 = vadd.f32 %v1619_v15, %v208_v14  ;;  %v244_v8 = vadd.f32 %v1619_v15, %v243_v2  ;;  %v1338_v14 = vld [vmem:[%s1825_s1 + $0x10] sm:$0xff] }
  0x9a   :  { %1232 = vmatmul.msk.bf16.gmra.mxu3 %vm590_vm2, %v1338_v14 }
  0x9b   :  { %v248_v19 = vmax.f32 %v209_v16, 0.0  ;;  %v262_v10 = vmax.f32 %v244_v8, 0.0  ;;  %v1345_v8 = vld [vmem:[%s1830_s6] sm:$0xff] }
  0xa0   :  { %v210_v17 = vpop.f32.mrf.mxu0  ;;  %v245_v7 = vpop.f32.mrf.mxu1 }
  0xa1   :  { %v211_v18 = vadd.f32 %v1619_v15, %v210_v17  ;;  %v246_v9 = vadd.f32 %v1619_v15, %v245_v7  ;;  %v1660_v17 = vld [vmem:[#allocation8 + $0x1] ss:$0 sm:$0xff]  ;;  %v1717_v7 = vld [vmem:[#allocation8 + $0x3] ss:$0 sm:$0xff] }
  0xa3   :  { %v249_v20 = vmax.f32 %v211_v18, 0.0  ;;  %v263_v11 = vmax.f32 %v246_v9, 0.0 }
  0xa5   :  { %v264_v21 = vpack.c.bf16 %v249_v20, %v248_v19  ;;  %v271_v13 = vpack.c.bf16 %v263_v11, %v262_v10 }
  0xa7   :  { %1162 = vmatmul.msk.bf16.vlgmr.msrb.gmra.mxu1 %vm305_vm1, %v264_v21 }
  0xa8   :  { %v213_v22 = vpop.f32.mrf.mxu0 }
  0xa9   :  { %v214_v23 = vadd.f32 %v1619_v15, %v213_v22 }
  0xab   :  { %v250_v26 = vmax.f32 %v214_v23, 0.0 }
  0xb0   :  { %v215_v24 = vpop.f32.mrf.mxu0 }
  0xb1   :  { %v216_v25 = vadd.f32 %v1619_v15, %v215_v24  ;;  %v1339_v24 = vld [vmem:[%s1825_s1 + $0x18] sm:$0xff] }
  0xb2   :  { %1233 = vmatmul.msk.bf16.gmra.mxu3 %vm590_vm2, %v1339_v24 }
  0xb3   :  { %v251_v27 = vmax.f32 %v216_v25, 0.0 }
  0xb5   :  { %v265_v28 = vpack.c.bf16 %v251_v27, %v250_v26 }
  0xb7   :  { %1163 = vmatmul.msk.bf16.gmra.mxu1 %vm305_vm1, %v265_v28 }
  0xb8   :  { %v218_v29 = vpop.f32.mrf.mxu0 }
  0xb9   :  { %v219_v31 = vadd.f32 %v1619_v15, %v218_v29  ;;  %v1348_v29 = vld [vmem:[%s1830_s6 + $0x18] sm:$0xff] }
  0xba   :  { %861 = vmatpush.bf16.msrb.mxu0 %v1348_v29 }
  0xbb   :  { %v252_v34 = vmax.f32 %v219_v31, 0.0 }
  0xc0   :  { %v220_v32 = vpop.f32.mrf.mxu0 }
  0xc1   :  { %v221_v33 = vadd.f32 %v1619_v15, %v220_v32 }
  0xc3   :  { %v253_v35 = vmax.f32 %v221_v33, 0.0  ;;  %v1340_v33 = vld [vmem:[%s1825_s1 + $0x20] sm:$0xff] }
  0xc4   :  { %1234 = vmatmul.msk.bf16.gmra.mxu3 %vm590_vm2, %v1340_v33 }
  0xc5   :  { %v266_v36 = vpack.c.bf16 %v253_v35, %v252_v34  ;;  %v1351_v34 = vld [vmem:[%s1830_s6 + $0x30] sm:$0xff] }
  0xc7   :  { %1164 = vmatmul.msk.bf16.vlgmr.msra.gmra.mxu2 %vm305_vm1, %v266_v36 }
  0xc8   :  { %v223_v37 = vpop.f32.mrf.mxu0 }
  0xc9   :  { %v224_v38 = vadd.f32 %v1619_v15, %v223_v37  ;;  %v1341_v37 = vld [vmem:[%s1825_s1 + $0x28] sm:$0xff] }
  0xcb   :  { %v254_v41 = vmax.f32 %v224_v38, 0.0 }
  0xd0   :  { %v225_v39 = vpop.f32.mrf.mxu0 }
  0xd1   :  { %v226_v40 = vadd.f32 %v1619_v15, %v225_v39 }
  0xd3   :  { %v255_v42 = vmax.f32 %v226_v40, 0.0 }
  0xd4   :  { %1235 = vmatmul.msk.bf16.gmra.mxu3 %vm590_vm2, %v1341_v37 }
  0xd5   :  { %v267_v43 = vpack.c.bf16 %v255_v42, %v254_v41 }
  0xd7   :  { %1165 = vmatmul.msk.bf16.gmra.mxu2 %vm305_vm1, %v267_v43  ;;  %v1347_v43 = vld [vmem:[%s1830_s6 + $0x10] sm:$0xff] }
  0xd8   :  { %v228_v45 = vpop.f32.mrf.mxu0  ;;  %862 = vmatpush.bf16.msrb.mxu0 %v1347_v43 }
  0xd9   :  { %v229_v46 = vadd.f32 %v1619_v15, %v228_v45 }
  0xdb   :  { %v256_v49 = vmax.f32 %v229_v46, 0.0  ;;  %v1342_v46 = vld [vmem:[%s1825_s1 + $0x30] sm:$0xff] }
  0xdc   :  { %863 = vmatpush.bf16.msrb.mxu0 %v1346_v61 }
  0xe0   :  { %v230_v47 = vpop.f32.mrf.mxu0  ;;  %864 = vmatpush.bf16.msrb.mxu0 %v1345_v8 }
  0xe1   :  { %v231_v48 = vadd.f32 %v1619_v15, %v230_v47 }
  0xe3   :  { %v257_v50 = vmax.f32 %v231_v48, 0.0 }
  0xe4   :  { %1236 = vmatmul.msk.bf16.gmra.mxu3 %vm590_vm2, %v1342_v46 }
  0xe5   :  { %v268_v51 = vpack.c.bf16 %v257_v50, %v256_v49 }
  0xe7   :  { %1166 = vmatmul.msk.bf16.gmra.mxu2 %vm305_vm1, %v268_v51 }
  0xe8   :  { %v233_v53 = vpop.f32.mrf.mxu0 }
  0xe9   :  { %v234_v54 = vadd.f32 %v1619_v15, %v233_v53 }
  0xeb   :  { %v258_v57 = vmax.f32 %v234_v54, 0.0 }
  0xf0   :  { %v235_v55 = vpop.f32.mrf.mxu0 }
  0xf1   :  { %v236_v56 = vadd.f32 %v1619_v15, %v235_v55  ;;  %v1343_v55 = vld [vmem:[%s1825_s1 + $0x38] sm:$0xff] }
  0xf3   :  { %v259_v58 = vmax.f32 %v236_v56, 0.0 }
  0xf4   :  { %1237 = vmatmul.msk.bf16.gmra.mxu3 %vm590_vm2, %v1343_v55 }
  0xf5   :  { %v269_v59 = vpack.c.bf16 %v259_v58, %v258_v57 }
  0xf7   :  { %1167 = vmatmul.msk.bf16.gmra.mxu2 %vm305_vm1, %v269_v59 }
  0xf8   :  { %v238_v62 = vpop.f32.mrf.mxu0 }
  0xf9   :  { %v239_v0 = vadd.f32 %v1619_v15, %v238_v62 }
  0xfb   :  { %v260_v4 = vmax.f32 %v239_v0, 0.0 }
 0x100   :  { %v240_v1 = vpop.f32.mrf.mxu0 }
 0x101   :  { %v241_v3 = vadd.f32 %v1619_v15, %v240_v1  ;;  %v1352_v15 = vld [vmem:[%s1830_s6 + $0x38] sm:$0xff] }
 0x102   :  { %764 = vmatpush.bf16.msrb.mxu3 %v1352_v15 }
 0x103   :  { %v261_v5 = vmax.f32 %v241_v3, 0.0 }
 0x105   :  { %v270_v6 = vpack.c.bf16 %v261_v5, %v260_v4  ;;  %v624_v4 = vpop.f32.mrf.mxu3 }
 0x106   :  { %765 = vmatpush.bf16.msrb.mxu3 %v1351_v34  ;;  %v625_v10 = vadd.f32 %v1717_v7, %v624_v4 }
 0x107   :  { %1168 = vmatmul.msk.bf16.gmra.mxu2 %vm305_vm1, %v270_v6  ;;  %v1349_v6 = vld [vmem:[%s1830_s6 + $0x20] sm:$0xff] }
 0x108   :  { %v664_v12 = vmax.f32 %v625_v10, 0.0 }
 0x10a   :  { %766 = vmatpush.bf16.msrb.mxu3 %v1350_v52 }
 0x10d   :  { %v626_v11 = vpop.f32.mrf.mxu3 }
 0x10e   :  { %767 = vmatpush.bf16.msrb.mxu3 %v1349_v6 }
 0x117   :  { %1169 = vmatmul.msk.bf16.gmra.mxu2 %vm305_vm1, %v271_v13  ;;  %v627_v13 = vadd.f32 %v1717_v7, %v626_v11 }
 0x119   :  { %v665_v15 = vmax.f32 %v627_v13, 0.0 }
 0x124   :  { %v339_v16 = vpop.f32.mrf.mxu1 }
 0x125   :  { %v340_v18 = vadd.f32 %v1660_v17, %v339_v16 }
 0x127   :  { %v379_v21 = vmax.f32 %v340_v18, 0.0 }
 0x12c   :  { %v341_v19 = vpop.f32.mrf.mxu1 }
 0x12d   :  { %v342_v20 = vadd.f32 %v1660_v17, %v341_v19  ;;  %v696_v19 = vpack.c.bf16 %v665_v15, %v664_v12 }
 0x12f   :  { %v380_v22 = vmax.f32 %v342_v20, 0.0  ;;  %1254 = vmatmul.msk.bf16.vlgmr.msrb.gmra.mxu3 %vm305_vm1, %v696_v19 }
 0x131   :  { %v395_v23 = vpack.c.bf16 %v380_v22, %v379_v21  ;;  %v629_v22 = vpop.f32.mrf.mxu3 }
 0x133   :  { %1186 = vmatmul.msk.bf16.vlgmr.msrb.gmra.mxu2 %vm305_vm1, %v395_v23 }
 0x134   :  { %v344_v25 = vpop.f32.mrf.mxu1 }
 0x135   :  { %v345_v26 = vadd.f32 %v1660_v17, %v344_v25  ;;  %v630_v25 = vadd.f32 %v1717_v7, %v629_v22 }
 0x137   :  { %v381_v30 = vmax.f32 %v345_v26, 0.0 }
 0x139   :  { %v631_v26 = vpop.f32.mrf.mxu3 }
 0x13c   :  { %v346_v27 = vpop.f32.mrf.mxu1 }
 0x13d   :  { %v347_v28 = vadd.f32 %v1660_v17, %v346_v27  ;;  %v666_v27 = vmax.f32 %v630_v25, 0.0 }
 0x13f   :  { %v382_v31 = vmax.f32 %v347_v28, 0.0  ;;  %v632_v28 = vadd.f32 %v1717_v7, %v631_v26 }
 0x141   :  { %v396_v32 = vpack.c.bf16 %v382_v31, %v381_v30  ;;  %v667_v30 = vmax.f32 %v632_v28, 0.0 }
 0x143   :  { %1187 = vmatmul.msk.bf16.gmra.mxu2 %vm305_vm1, %v396_v32  ;;  %v697_v33 = vpack.c.bf16 %v667_v30, %v666_v27 }
 0x145   :  { %1255 = vmatmul.msk.bf16.gmra.mxu3 %vm305_vm1, %v697_v33 }
 0x14a   :  { %v349_v35 = vpop.f32.mrf.mxu2 }
 0x14b   :  { %v350_v36 = vadd.f32 %v1660_v17, %v349_v35 }
 0x14d   :  { %v383_v40 = vmax.f32 %v350_v36, 0.0  ;;  %v634_v36 = vpop.f32.mrf.mxu3 }
 0x152   :  { %v351_v38 = vpop.f32.mrf.mxu2 }
 0x153   :  { %v352_v39 = vadd.f32 %v1660_v17, %v351_v38  ;;  %v635_v38 = vadd.f32 %v1717_v7, %v634_v36 }
 0x155   :  { %v384_v41 = vmax.f32 %v352_v39, 0.0  ;;  %v636_v39 = vpop.f32.mrf.mxu3 }
 0x157   :  { %v397_v42 = vpack.c.bf16 %v384_v41, %v383_v40  ;;  %v668_v40 = vmax.f32 %v635_v38, 0.0  ;;  %v637_v41 = vadd.f32 %v1717_v7, %v636_v39 }
 0x159   :  { %1188 = vmatmul.msk.bf16.gmra.mxu2 %vm305_vm1, %v397_v42  ;;  %v669_v42 = vmax.f32 %v637_v41, 0.0 }
 0x15a   :  { %v354_v44 = vpop.f32.mrf.mxu2 }
 0x15b   :  { %v355_v45 = vadd.f32 %v1660_v17, %v354_v44  ;;  %v698_v43 = vpack.c.bf16 %v669_v42, %v668_v40 }
 0x15d   :  { %v385_v49 = vmax.f32 %v355_v45, 0.0  ;;  %1256 = vmatmul.msk.bf16.gmra.mxu3 %vm305_vm1, %v698_v43  ;;  %v639_v44 = vpop.f32.mrf.mxu3  ;;  %v1738_v45 = vld [vmem:[#allocation8 + $0x2] ss:$0 sm:$0xff] }
 0x15e   :  { %v640_v46 = vadd.f32 %v1717_v7, %v639_v44 }
 0x162   :  { %v356_v47 = vpop.f32.mrf.mxu2 }
 0x163   :  { %v357_v48 = vadd.f32 %v1660_v17, %v356_v47 }
 0x165   :  { %v386_v50 = vmax.f32 %v357_v48, 0.0 }
 0x167   :  { %v398_v51 = vpack.c.bf16 %v386_v50, %v385_v49  ;;  %v641_v49 = vpop.f32.mrf.mxu3 }
 0x168   :  { %v642_v52 = vadd.f32 %v1717_v7, %v641_v49 }
 0x169   :  { %1189 = vmatmul.msk.bf16.gmra.mxu2 %vm305_vm1, %v398_v51  ;;  %v670_v51 = vmax.f32 %v640_v46, 0.0 }
 0x16a   :  { %v359_v53 = vpop.f32.mrf.mxu2  ;;  %v671_v55 = vmax.f32 %v642_v52, 0.0 }
 0x16b   :  { %v360_v54 = vadd.f32 %v1660_v17, %v359_v53 }
 0x16d   :  { %v387_v58 = vmax.f32 %v360_v54, 0.0 }
 0x172   :  { %v361_v56 = vpop.f32.mrf.mxu2 }
 0x173   :  { %v362_v57 = vadd.f32 %v1660_v17, %v361_v56 }
 0x175   :  { %v388_v59 = vmax.f32 %v362_v57, 0.0  ;;  %v699_v57 = vpack.c.bf16 %v671_v55, %v670_v51 }
 0x177   :  { %v399_v60 = vpack.c.bf16 %v388_v59, %v387_v58  ;;  %1257 = vmatmul.msk.bf16.gmra.mxu3 %vm305_vm1, %v699_v57  ;;  %v644_v59 = vpop.f32.mrf.mxu3 }
 0x179   :  { %1190 = vmatmul.msk.bf16.gmra.mxu2 %vm305_vm1, %v399_v60  ;;  %v645_v60 = vadd.f32 %v1717_v7, %v644_v59 }
 0x17a   :  { %v364_v62 = vpop.f32.mrf.mxu2 }
 0x17b   :  { %v365_v63 = vadd.f32 %v1660_v17, %v364_v62 }
 0x17d   :  { %v389_v2 = vmax.f32 %v365_v63, 0.0 }
 0x17f   :  { %v646_v63 = vpop.f32.mrf.mxu3 }
 0x182   :  { %v366_v0 = vpop.f32.mrf.mxu2 }
 0x183   :  { %v367_v1 = vadd.f32 %v1660_v17, %v366_v0 }
 0x185   :  { %v390_v3 = vmax.f32 %v367_v1, 0.0  ;;  %v672_v1 = vmax.f32 %v645_v60, 0.0  ;;  %v1358_v60 = vld [vmem:[%s1831_s7 + $0x28] sm:$0xff] }
 0x187   :  { %v400_v5 = vpack.c.bf16 %v390_v3, %v389_v2  ;;  %v647_v2 = vadd.f32 %v1717_v7, %v646_v63  ;;  %v1356_v63 = vld [vmem:[%s1831_s7 + $0x18] sm:$0xff] }
 0x189   :  { %1191 = vmatmul.msk.bf16.gmra.mxu2 %vm305_vm1, %v400_v5  ;;  %v673_v5 = vmax.f32 %v647_v2, 0.0 }
 0x18a   :  { %v369_v9 = vpop.f32.mrf.mxu2 }
 0x18b   :  { %v370_v14 = vadd.f32 %v1660_v17, %v369_v9  ;;  %v700_v8 = vpack.c.bf16 %v673_v5, %v672_v1  ;;  %v649_v9 = vpop.f32.mrf.mxu3 }
 0x18c   :  { %v650_v10 = vadd.f32 %v1717_v7, %v649_v9  ;;  %v1354_v9 = vld [vmem:[%s1831_s7 + $0x8] sm:$0xff] }
 0x18d   :  { %v391_v20 = vmax.f32 %v370_v14, 0.0  ;;  %1258 = vmatmul.msk.bf16.gmra.mxu3 %vm305_vm1, %v700_v8 }
 0x18e   :  { %v674_v13 = vmax.f32 %v650_v10, 0.0 }
 0x192   :  { %v371_v16 = vpop.f32.mrf.mxu2 }
 0x193   :  { %v372_v18 = vadd.f32 %v1660_v17, %v371_v16  ;;  %v651_v12 = vpop.f32.mrf.mxu3 }
 0x194   :  { %v652_v14 = vadd.f32 %v1717_v7, %v651_v12 }
 0x195   :  { %v392_v21 = vmax.f32 %v372_v18, 0.0 }
 0x196   :  { %v675_v15 = vmax.f32 %v652_v14, 0.0 }
 0x197   :  { %v401_v23 = vpack.c.bf16 %v392_v21, %v391_v20 }
 0x198   :  { %v701_v18 = vpack.c.bf16 %v675_v15, %v674_v13 }
 0x199   :  { %1192 = vmatmul.msk.bf16.gmra.mxu2 %vm305_vm1, %v401_v23 }
 0x19a   :  { %v374_v24 = vpop.f32.mrf.mxu2 }
 0x19b   :  { %v375_v29 = vadd.f32 %v1660_v17, %v374_v24  ;;  %v654_v21 = vpop.f32.mrf.mxu3 }
 0x19c   :  { %v655_v25 = vadd.f32 %v1717_v7, %v654_v21 }
 0x19d   :  { %v393_v34 = vmax.f32 %v375_v29, 0.0  ;;  %1259 = vmatmul.msk.bf16.gmra.mxu3 %vm305_vm1, %v701_v18 }
 0x19e   :  { %v676_v28 = vmax.f32 %v655_v25, 0.0 }
 0x1a2   :  { %v376_v31 = vpop.f32.mrf.mxu2 }
 0x1a3   :  { %v377_v32 = vadd.f32 %v1660_v17, %v376_v31  ;;  %v656_v27 = vpop.f32.mrf.mxu3 }
 0x1a4   :  { %v657_v29 = vadd.f32 %v1717_v7, %v656_v27 }
 0x1a5   :  { %v394_v35 = vmax.f32 %v377_v32, 0.0 }
 0x1a6   :  { %v677_v30 = vmax.f32 %v657_v29, 0.0 }
 0x1a7   :  { %v402_v37 = vpack.c.bf16 %v394_v35, %v393_v34 }
 0x1a8   :  { %v702_v32 = vpack.c.bf16 %v677_v30, %v676_v28 }
 0x1a9   :  { %1193 = vmatmul.msk.bf16.gmra.mxu2 %vm305_vm1, %v402_v37 }
 0x1ab   :  { %v659_v35 = vpop.f32.mrf.mxu3 }
 0x1ac   :  { %v660_v39 = vadd.f32 %v1717_v7, %v659_v35 }
 0x1ad   :  { %1260 = vmatmul.msk.bf16.gmra.mxu3 %vm305_vm1, %v702_v32 }
 0x1ae   :  { %v678_v42 = vmax.f32 %v660_v39, 0.0 }
 0x1b3   :  { %v661_v41 = vpop.f32.mrf.mxu3 }
 0x1b4   :  { %v662_v43 = vadd.f32 %v1717_v7, %v661_v41 }
 0x1b6   :  { %v469_v17 = vpop.f32.mrf.mxu2 }
 0x1b7   :  { %v470_v47 = vadd.f32 %v1738_v45, %v469_v17  ;;  %v679_v17 = vmax.f32 %v662_v43, 0.0 }
 0x1b9   :  { %v509_v53 = vmax.f32 %v470_v47, 0.0  ;;  %v703_v46 = vpack.c.bf16 %v679_v17, %v678_v42 }
 0x1bb   :  { %v769_v8 = vpop.f32.mrf.mxu3 }
 0x1bd   :  { %1261 = vmatmul.msk.bf16.gmra.mxu3 %vm305_vm1, %v703_v46 }
 0x1be   :  { %v471_v48 = vpop.f32.mrf.mxu2 }
 0x1bf   :  { %v472_v50 = vadd.f32 %v1738_v45, %v471_v48 }
 0x1c1   :  { %v510_v54 = vmax.f32 %v472_v50, 0.0 }
 0x1c3   :  { %v680_v56 = vpack.c.bf16 %v510_v54, %v509_v53  ;;  %v1360_v53 = vld [vmem:[%s1831_s7 + $0x38] sm:$0xff]  ;;  %v771_v14 = vpop.f32.mrf.mxu3 }
 0x1c4   :  { %1012 = vmatpush.bf16.msra.mxu1 %v1360_v53 }
 0x1c5   :  { %1278 = vmatmul.msk.bf16.vlgmr.msrb.gmra.mxu0 %vm305_vm1, %v680_v56  ;;  %v1359_v56 = vld [vmem:[%s1831_s7 + $0x30] sm:$0xff] }
 0x1c6   :  { %v474_v58 = vpop.f32.mrf.mxu2 }
 0x1c7   :  { %v475_v61 = vadd.f32 %v1738_v45, %v474_v58 }
 0x1c8   :  { %1013 = vmatpush.bf16.msra.mxu1 %v1359_v56 }
 0x1c9   :  { %v511_v3 = vmax.f32 %v475_v61, 0.0 }
 0x1cc   :  { %1014 = vmatpush.bf16.msra.mxu1 %v1358_v60 }
 0x1ce   :  { %v476_v62 = vpop.f32.mrf.mxu2 }
 0x1cf   :  { %v477_v0 = vadd.f32 %v1738_v45, %v476_v62  ;;  %v1357_v62 = vld [vmem:[%s1831_s7 + $0x20] sm:$0xff] }
 0x1d0   :  { %1015 = vmatpush.bf16.msra.mxu1 %v1357_v62 }
 0x1d1   :  { %v512_v4 = vmax.f32 %v477_v0, 0.0 }
 0x1d3   :  { %v681_v6 = vpack.c.bf16 %v512_v4, %v511_v3  ;;  %v1355_v3 = vld [vmem:[%s1831_s7 + $0x10] sm:$0xff] }
 0x1d4   :  { %1016 = vmatpush.bf16.msra.mxu1 %v1356_v63 }
 0x1d5   :  { %1279 = vmatmul.msk.bf16.gmra.mxu0 %vm305_vm1, %v681_v6 }
 0x1d8   :  { %1017 = vmatpush.bf16.msra.mxu1 %v1355_v3 }
 0x1dc   :  { %v479_v11 = vpop.f32.mrf.mxu2  ;;  %1018 = vmatpush.bf16.msra.mxu1 %v1354_v9 }
 0x1dd   :  { %v480_v16 = vadd.f32 %v1738_v45, %v479_v11  ;;  %v1353_v11 = vld [vmem:[%s1831_s7] sm:$0xff]  ;;  %s1516_s7 = smov [#allocation10]  }
 0x1de   :  { %s1081_s17 = sshll.u32 %s1516_s7, 4  ;;  %s1082_s17 = int_to_ptr.vmem [resolvable:$true] %s1081_s17 }
 0x1df   :  { %v513_v22 = vmax.f32 %v480_v16, 0.0 }
 0x1e0   :  { %1019 = vmatpush.bf16.msra.mxu1 %v1353_v11 }
 0x1e4   :  { %v481_v19 = vpop.f32.mrf.mxu2 }
 0x1e5   :  { %v482_v20 = vadd.f32 %v1738_v45, %v481_v19 }
 0x1e7   :  { %v514_v23 = vmax.f32 %v482_v20, 0.0  ;;  %v774_v20 = vpop.f32.mrf.mxu3 }
 0x1e9   :  { %v682_v24 = vpack.c.bf16 %v514_v23, %v513_v22  ;;  %v1803_v23 = vld [vmem:[#allocation8 + $0x4] ss:$0 sm:$0xff] }
 0x1eb   :  { %1280 = vmatmul.msk.bf16.gmra.mxu0 %vm305_vm1, %v682_v24 }
 0x1ec   :  { %v484_v26 = vpop.f32.mrf.mxu2 }
 0x1ed   :  { %v485_v31 = vadd.f32 %v1738_v45, %v484_v26 }
 0x1ef   :  { %v515_v36 = vmax.f32 %v485_v31, 0.0  ;;  %v776_v24 = vpop.f32.mrf.mxu3 }
 0x1f4   :  { %v486_v33 = vpop.f32.mrf.mxu2 }
 0x1f5   :  { %v487_v34 = vadd.f32 %v1738_v45, %v486_v33 }
 0x1f7   :  { %v516_v37 = vmax.f32 %v487_v34, 0.0  ;;  %v779_v32 = vpop.f32.mrf.mxu3 }
 0x1f9   :  { %v683_v38 = vpack.c.bf16 %v516_v37, %v515_v36 }
 0x1fb   :  { %1281 = vmatmul.msk.bf16.gmra.mxu0 %vm305_vm1, %v683_v38 }
 0x1fc   :  { %v489_v40 = vpop.f32.mrf.mxu2 }
 0x1fd   :  { %v490_v44 = vadd.f32 %v1738_v45, %v489_v40 }
 0x1ff   :  { %v517_v49 = vmax.f32 %v490_v44, 0.0  ;;  %v781_v37 = vpop.f32.mrf.mxu3 }
 0x204   :  { %v491_v47 = vpop.f32.mrf.mxu2 }
 0x205   :  { %v492_v48 = vadd.f32 %v1738_v45, %v491_v47 }
 0x207   :  { %v518_v50 = vmax.f32 %v492_v48, 0.0  ;;  %v784_v42 = vpop.f32.mrf.mxu3 }
 0x209   :  { %v684_v51 = vpack.c.bf16 %v518_v50, %v517_v49 }
 0x20b   :  { %1282 = vmatmul.msk.bf16.gmra.mxu0 %vm305_vm1, %v684_v51 }
 0x20c   :  { %v494_v52 = vpop.f32.mrf.mxu2 }
 0x20d   :  { %v495_v7 = vadd.f32 %v1738_v45, %v494_v52 }
 0x20f   :  { %v519_v57 = vmax.f32 %v495_v7, 0.0  ;;  %v786_v44 = vpop.f32.mrf.mxu3 }
 0x214   :  { %v496_v54 = vpop.f32.mrf.mxu2 }
 0x215   :  { %v497_v55 = vadd.f32 %v1738_v45, %v496_v54 }
 0x217   :  { %v520_v58 = vmax.f32 %v497_v55, 0.0  ;;  %v789_v7 = vpop.f32.mrf.mxu3 }
 0x219   :  { %v685_v59 = vpack.c.bf16 %v520_v58, %v519_v57 }
 0x21b   :  { %1283 = vmatmul.msk.bf16.gmra.mxu0 %vm305_vm1, %v685_v59 }
 0x21c   :  { %v499_v61 = vpop.f32.mrf.mxu2 }
 0x21d   :  { %v500_v0 = vadd.f32 %v1738_v45, %v499_v61 }
 0x21f   :  { %v521_v4 = vmax.f32 %v500_v0, 0.0  ;;  %v791_v59 = vpop.f32.mrf.mxu3 }
 0x224   :  { %v501_v1 = vpop.f32.mrf.mxu2 }
 0x225   :  { %v502_v2 = vadd.f32 %v1738_v45, %v501_v1 }
 0x227   :  { %v522_v5 = vmax.f32 %v502_v2, 0.0  ;;  %v794_v1 = vpop.f32.mrf.mxu3 }
 0x229   :  { %v686_v6 = vpack.c.bf16 %v522_v5, %v521_v4 }
 0x22b   :  { %1284 = vmatmul.msk.bf16.gmra.mxu0 %vm305_vm1, %v686_v6 }
 0x22c   :  { %v504_v10 = vpop.f32.mrf.mxu2 }
 0x22d   :  { %v505_v12 = vadd.f32 %v1738_v45, %v504_v10 }
 0x22f   :  { %v523_v16 = vmax.f32 %v505_v12, 0.0  ;;  %v796_v10 = vpop.f32.mrf.mxu3 }
 0x234   :  { %v506_v13 = vpop.f32.mrf.mxu2 }
 0x235   :  { %v507_v15 = vadd.f32 %v1738_v45, %v506_v13 }
 0x237   :  { %v524_v18 = vmax.f32 %v507_v15, 0.0 }
 0x239   :  { %v687_v19 = vpack.c.bf16 %v524_v18, %v523_v16  ;;  %v799_v16 = vpop.f32.mrf.mxu3 }
 0x23b   :  { %1285 = vmatmul.msk.bf16.gmra.mxu0 %vm305_vm1, %v687_v19 }
 0x242   :  { %v866_v21 = vpop.f32.mrf.mxu0 }
 0x243   :  { %v867_v22 = vadd.f32 %v866_v21, %v769_v8 }
 0x245   :  { %v907_v26 = vadd.f32 %v1803_v23, %v867_v22 }
 0x247   :  { %v923_v29 = vmax.f32 %v907_v26, 0.0 }
 0x24a   :  { %v868_v25 = vpop.f32.mrf.mxu0 }
 0x24b   :  { %v869_v27 = vadd.f32 %v868_v25, %v771_v14 }
 0x24d   :  { %v908_v28 = vadd.f32 %v1803_v23, %v869_v27 }
 0x24f   :  { %v924_v30 = vmax.f32 %v908_v28, 0.0 }
 0x251   :  { %v939_v45 = vpack.c.bf16 %v924_v30, %v923_v29 }
 0x252   :  { %v871_v31 = vpop.f32.mrf.mxu0 }
 0x253   :  { %1020 = vmatmul.bf16.vlgmr.msra.gmra.mxu1 %v939_v45  ;;  %v872_v33 = vadd.f32 %v871_v31, %v774_v20 }
 0x255   :  { %v909_v35 = vadd.f32 %v1803_v23, %v872_v33 }
 0x257   :  { %v925_v39 = vmax.f32 %v909_v35, 0.0 }
 0x25a   :  { %v873_v34 = vpop.f32.mrf.mxu0 }
 0x25b   :  { %v874_v36 = vadd.f32 %v873_v34, %v776_v24  ;;  %v801_v24 = vpop.f32.mrf.mxu3 }
 0x25d   :  { %v910_v38 = vadd.f32 %v1803_v23, %v874_v36 }
 0x25f   :  { %v926_v40 = vmax.f32 %v910_v38, 0.0 }
 0x261   :  { %v940_v41 = vpack.c.bf16 %v926_v40, %v925_v39 }
 0x263   :  { %1025 = vmatmul.bf16.gmra.mxu1 %v940_v41  ;;  %v804_v31 = vpop.f32.mrf.mxu3 }
 0x268   :  { %v876_v43 = vpop.f32.mrf.mxu0 }
 0x269   :  { %v877_v17 = vadd.f32 %v876_v43, %v779_v32  ;;  %v1381_v43 = vld [vmem:[#allocation8 + $0x5] ss:$0 sm:$0xff] }
 0x26b   :  { %v911_v47 = vadd.f32 %v1803_v23, %v877_v17  ;;  %v806_v35 = vpop.f32.mrf.mxu3 }
 0x26d   :  { %v927_v50 = vmax.f32 %v911_v47, 0.0 }
 0x270   :  { %v878_v46 = vpop.f32.mrf.mxu0 }
 0x271   :  { %v879_v48 = vadd.f32 %v878_v46, %v781_v37 }
 0x273   :  { %v912_v49 = vadd.f32 %v1803_v23, %v879_v48 }
 0x275   :  { %v928_v51 = vmax.f32 %v912_v49, 0.0 }
 0x277   :  { %v941_v52 = vpack.c.bf16 %v928_v51, %v927_v50 }
 0x278   :  { %v881_v53 = vpop.f32.mrf.mxu0 }
 0x279   :  { %1030 = vmatmul.bf16.gmra.mxu1 %v941_v52  ;;  %v882_v54 = vadd.f32 %v881_v53, %v784_v42 }
 0x27b   :  { %v913_v56 = vadd.f32 %v1803_v23, %v882_v54 }
 0x27d   :  { %v929_v60 = vmax.f32 %v913_v56, 0.0 }
 0x280   :  { %v883_v55 = vpop.f32.mrf.mxu0 }
 0x281   :  { %v884_v57 = vadd.f32 %v883_v55, %v786_v44 }
 0x283   :  { %v914_v58 = vadd.f32 %v1803_v23, %v884_v57 }
 0x285   :  { %v930_v61 = vmax.f32 %v914_v58, 0.0 }
 0x287   :  { %v942_v62 = vpack.c.bf16 %v930_v61, %v929_v60 }
 0x288   :  { %v886_v63 = vpop.f32.mrf.mxu0 }
 0x289   :  { %1035 = vmatmul.bf16.gmra.mxu1 %v942_v62  ;;  %v887_v0 = vadd.f32 %v886_v63, %v789_v7 }
 0x28b   :  { %v915_v3 = vadd.f32 %v1803_v23, %v887_v0 }
 0x28d   :  { %v931_v6 = vmax.f32 %v915_v3, 0.0 }
 0x290   :  { %v888_v2 = vpop.f32.mrf.mxu0 }
 0x291   :  { %v889_v4 = vadd.f32 %v888_v2, %v791_v59 }
 0x293   :  { %v916_v5 = vadd.f32 %v1803_v23, %v889_v4 }
 0x295   :  { %v932_v8 = vmax.f32 %v916_v5, 0.0 }
 0x297   :  { %v943_v9 = vpack.c.bf16 %v932_v8, %v931_v6 }
 0x298   :  { %v891_v11 = vpop.f32.mrf.mxu0 }
 0x299   :  { %1040 = vmatmul.bf16.gmra.mxu1 %v943_v9  ;;  %v892_v12 = vadd.f32 %v891_v11, %v794_v1 }
 0x29b   :  { %v917_v14 = vadd.f32 %v1803_v23, %v892_v12 }
 0x29d   :  { %v933_v19 = vmax.f32 %v917_v14, 0.0 }
 0x2a0   :  { %v893_v13 = vpop.f32.mrf.mxu0 }
 0x2a1   :  { %v894_v15 = vadd.f32 %v893_v13, %v796_v10 }
 0x2a3   :  { %v918_v18 = vadd.f32 %v1803_v23, %v894_v15 }
 0x2a5   :  { %v934_v20 = vmax.f32 %v918_v18, 0.0 }
 0x2a7   :  { %v944_v21 = vpack.c.bf16 %v934_v20, %v933_v19 }
 0x2a8   :  { %v896_v22 = vpop.f32.mrf.mxu0 }
 0x2a9   :  { %1045 = vmatmul.bf16.gmra.mxu1 %v944_v21  ;;  %v897_v25 = vadd.f32 %v896_v22, %v799_v16 }
 0x2ab   :  { %v919_v27 = vadd.f32 %v1803_v23, %v897_v25 }
 0x2ad   :  { %v935_v30 = vmax.f32 %v919_v27, 0.0 }
 0x2b0   :  { %v898_v26 = vpop.f32.mrf.mxu0 }
 0x2b1   :  { %v899_v28 = vadd.f32 %v898_v26, %v801_v24 }
 0x2b3   :  { %v920_v29 = vadd.f32 %v1803_v23, %v899_v28 }
 0x2b5   :  { %v936_v45 = vmax.f32 %v920_v29, 0.0 }
 0x2b7   :  { %v945_v32 = vpack.c.bf16 %v936_v45, %v935_v30 }
 0x2b8   :  { %v901_v33 = vpop.f32.mrf.mxu0 }
 0x2b9   :  { %1050 = vmatmul.bf16.gmra.mxu1 %v945_v32  ;;  %v902_v34 = vadd.f32 %v901_v33, %v804_v31 }
 0x2bb   :  { %v921_v37 = vadd.f32 %v1803_v23, %v902_v34 }
 0x2bd   :  { %v937_v40 = vmax.f32 %v921_v37, 0.0 }
 0x2c0   :  { %v903_v36 = vpop.f32.mrf.mxu0 }
 0x2c1   :  { %v904_v38 = vadd.f32 %v903_v36, %v806_v35 }
 0x2c3   :  { %v922_v39 = vadd.f32 %v1803_v23, %v904_v38 }
 0x2c5   :  { %v938_v41 = vmax.f32 %v922_v39, 0.0 }
 0x2c7   :  { %v946_v42 = vpack.c.bf16 %v938_v41, %v937_v40 }
 0x2c9   :  { %1055 = vmatmul.bf16.gmra.mxu1 %v946_v42 }
 0x2d0   :  { %v1021_v17 = vpop.f32.mrf.mxu1 }
 0x2d1   :  { %v1022_v44 = vadd.f32 %v1381_v43, %v1021_v17 }
 0x2d3   :  { %1061 = vst [vmem:[#allocation10] sm:$0xff] %v1022_v44 }
 0x2d8   :  { %v1023_v46 = vpop.f32.mrf.mxu1 }
 0x2d9   :  { %v1024_v47 = vadd.f32 %v1381_v43, %v1023_v46 }
 0x2db   :  { %1062 = vst [vmem:[#allocation10 + $0x8] sm:$0xff] %v1024_v47 }
 0x2e0   :  { %v1026_v48 = vpop.f32.mrf.mxu1 }
 0x2e1   :  { %v1027_v49 = vadd.f32 %v1381_v43, %v1026_v48 }
 0x2e3   :  { %1063 = vst [vmem:[#allocation10 + $0x10] sm:$0xff] %v1027_v49 }
 0x2e8   :  { %v1028_v50 = vpop.f32.mrf.mxu1 }
 0x2e9   :  { %v1029_v51 = vadd.f32 %v1381_v43, %v1028_v50 }
 0x2eb   :  { %1064 = vst [vmem:[#allocation10 + $0x18] sm:$0xff] %v1029_v51 }
 0x2f6   :  { %v1031_v52 = vpop.f32.mrf.mxu1 }
 0x2f7   :  { %v1032_v53 = vadd.f32 %v1381_v43, %v1031_v52 }
 0x2f9   :  { %1065 = vst [vmem:[#allocation10 + $0x20] sm:$0xff] %v1032_v53 }
 0x2fe   :  { %v1033_v23 = vpop.f32.mrf.mxu1 }
 0x2ff   :  { %v1034_v7 = vadd.f32 %v1381_v43, %v1033_v23 }
 0x301   :  { %1066 = vst [vmem:[#allocation10 + $0x28] sm:$0xff] %v1034_v7 }
 0x306   :  { %v1036_v54 = vpop.f32.mrf.mxu1 }
 0x307   :  { %v1037_v55 = vadd.f32 %v1381_v43, %v1036_v54 }
 0x309   :  { %1067 = vst [vmem:[#allocation10 + $0x30] sm:$0xff] %v1037_v55 }
 0x30e   :  { %v1038_v56 = vpop.f32.mrf.mxu1 }
 0x30f   :  { %v1039_v57 = vadd.f32 %v1381_v43, %v1038_v56 }
 0x311   :  { %1068 = vst [vmem:[#allocation10 + $0x38] sm:$0xff] %v1039_v57 }
 0x316   :  { %v1041_v58 = vpop.f32.mrf.mxu1 }
 0x317   :  { %v1042_v59 = vadd.f32 %v1381_v43, %v1041_v58 }
 0x319   :  { %1069 = vst [vmem:[#allocation10 + $0x40] sm:$0xff] %v1042_v59 }
 0x31e   :  { %v1043_v60 = vpop.f32.mrf.mxu1 }
 0x31f   :  { %v1044_v61 = vadd.f32 %v1381_v43, %v1043_v60 }
 0x321   :  { %1070 = vst [vmem:[#allocation10 + $0x48] sm:$0xff] %v1044_v61 }
 0x326   :  { %v1046_v62 = vpop.f32.mrf.mxu1 }
 0x327   :  { %v1047_v63 = vadd.f32 %v1381_v43, %v1046_v62 }
 0x329   :  { %1071 = vst [vmem:[#allocation10 + $0x50] sm:$0xff] %v1047_v63 }
 0x32e   :  { %v1048_v0 = vpop.f32.mrf.mxu1 }
 0x32f   :  { %v1049_v1 = vadd.f32 %v1381_v43, %v1048_v0 }
 0x331   :  { %1072 = vst [vmem:[#allocation10 + $0x58] sm:$0xff] %v1049_v1 }
 0x336   :  { %v1051_v2 = vpop.f32.mrf.mxu1 }
 0x337   :  { %v1052_v3 = vadd.f32 %v1381_v43, %v1051_v2 }
 0x339   :  { %1073 = vst [vmem:[#allocation10 + $0x60] sm:$0xff] %v1052_v3 }
 0x33e   :  { %v1053_v4 = vpop.f32.mrf.mxu1 }
 0x33f   :  { %v1054_v5 = vadd.f32 %v1381_v43, %v1053_v4 }
 0x341   :  { %1074 = vst [vmem:[#allocation10 + $0x68] sm:$0xff] %v1054_v5 }
 0x346   :  { %v1056_v6 = vpop.f32.mrf.mxu1 }
 0x347   :  { %v1057_v8 = vadd.f32 %v1381_v43, %v1056_v6 }
 0x349   :  { %1075 = vst [vmem:[#allocation10 + $0x70] sm:$0xff] %v1057_v8 }
 0x34e   :  { %v1058_v9 = vpop.f32.mrf.mxu1 }
 0x34f   :  { %v1059_v10 = vadd.f32 %v1381_v43, %v1058_v9 }
 0x351   :  { %1076 = vst [vmem:[#allocation10 + $0x78] sm:$0xff] %v1059_v10 }
 0x352   :  { %1089 = dma.vmem_to_hbm [thread:$0]  %s1082_s17, 2048, %s1084_s20, [#allocation4], %s1517_s21, %s1517_s21, %s1518_s22  }
 0x353   :  { %1508 = dma.done.wait [#allocation4], 2048  }
 0x354   :  { %1509 = vsyncadd [#allocation4], 4294965248 }
 0x355   :  { %1094 = vsyncpa [#allocation3], 1 }
 0x356   :  { %1095 = vsyncpa [#allocation6], 1 }
 0x357   :  { %1096 = vsyncpa [#allocation9], 1 }
 0x358   :  { %1097 = vsyncpa [#allocation4], 1 }

</bundles_post_ra>
